<compile_context>
chip_gen: v5e
topology: v5e:2x2
jax: 0.10.0
libtpu: 0.0.40
codegen_flags: <defaults>
</compile_context>

<pallas_src>
import numpy as np
import jax
import jax.numpy as jnp
from jax.experimental import pallas as pl
from jax.experimental.pallas import tpu as pltpu

EPS = 1e-5
LANE = 128


def _neighbors(x, mprev, mnext):
    """Row-shifted copies of x:(R, C): (x[l-1], x[l+1]) with zero rows at block edges and
    at every batch-element boundary (masks mprev/mnext are (R, 1) 0/1 arrays)."""
    C = x.shape[1]
    zrow = jnp.zeros((1, C), dtype=x.dtype)
    x_prev = jnp.concatenate([zrow, x[:-1, :]], axis=0) * mprev
    x_next = jnp.concatenate([x[1:, :], zrow], axis=0) * mnext
    return x_prev, x_next


def _partial_stats(v):
    """Per-channel (sum, sum-of-squares) over rows of v:(R, C) -> (2, C)."""
    s = jnp.sum(v, axis=0, keepdims=True)
    ss = jnp.sum(v * v, axis=0, keepdims=True)
    return jnp.concatenate([s, ss], axis=0)


def _conv1_stats_kernel(x_ref, mp_ref, mn_ref, w_ref, h_ref, st_ref):
    # x_ref: (R, Cin)   w_ref: (3, Cin, Cp)   h_ref: (R, Cp)   st_ref: (1, 2, Cp)
    x = x_ref[...]
    x_prev, x_next = _neighbors(x, mp_ref[...], mn_ref[...])
    h = (jnp.dot(x_prev, w_ref[0], preferred_element_type=jnp.float32)
         + jnp.dot(x, w_ref[1], preferred_element_type=jnp.float32)
         + jnp.dot(x_next, w_ref[2], preferred_element_type=jnp.float32))
    h_ref[...] = h
    st_ref[0] = _partial_stats(h)          # BN1 partials, fused with the conv pass


def _bn_relu_conv2_stats_kernel(h_ref, mp_ref, mn_ref, sc_ref, sh_ref, w_ref, y_ref, st_ref):
    # h_ref: (R, Cp)  sc/sh_ref: (1, Cp) folded BN1 scale/shift  w_ref: (3*Cp, Cp)
    a = jnp.maximum(h_ref[...] * sc_ref[...] + sh_ref[...], 0.0)     # BN1 + ReLU (folded affine)
    a_prev, a_next = _neighbors(a, mp_ref[...], mn_ref[...])
    acat = jnp.concatenate([a_prev, a, a_next], axis=-1)             # (R, 3*Cp), lane-aligned pieces
    y = jnp.dot(acat, w_ref[...], preferred_element_type=jnp.float32)  # single K=3*Cp MXU matmul
    y_ref[...] = y
    st_ref[0] = _partial_stats(y)          # BN2 partials, fused with the conv pass


def _fold_bn(partials, count, gamma, beta):
    """partials: (G, 2, Cp) per-block (sum, sumsq). Returns folded (scale, shift), each (1, Cp).
    NOTE: one-pass variance in f32; fine at these magnitudes/tolerances (see review note)."""
    total = partials.sum(axis=0)                              # (2, Cp)
    mean = total[0] / count
    var = jnp.maximum(total[1] / count - mean * mean, 0.0)    # biased variance (train-mode BN)
    scale = gamma * jax.lax.rsqrt(var + EPS)
    shift = beta - mean * scale
    return scale.reshape(1, -1), shift.reshape(1, -1)


def _vmem_limit_bytes():
    try:
        cap = int(pltpu.get_tpu_info().vmem_capacity_bytes)
    except Exception:  # no hardware info available (e.g. interpret mode): assume 128 MiB
        cap = 128 * 1024 * 1024
    # ~half of physical VMEM: 64 MiB on v5e/v6e (128 MiB phys), 32 MiB on v7x (64 MiB phys)
    return min(cap // 2, 64 * 1024 * 1024)


def _choose_block_batch(N, L, Cp, vmem_limit):
    """Whole batch elements per grid step: target >=512-row DMA slabs within the VMEM budget."""
    bytes_per_row = 4 * 9 * Cp                     # ~pass-2 live f32 bytes/row (dbuf in/out + temps)
    max_rows = max(L, vmem_limit // (2 * bytes_per_row))
    cands = [bt for bt in range(1, N + 1)
             if N % bt == 0 and (bt == N or (bt * L) % 8 == 0)]   # keep (8,128)-legal blocks
    fitting = [bt for bt in cands if bt * L <= max_rows] or [cands[0]]
    for bt in fitting:
        if bt * L >= 512:
            return bt
    return fitting[-1]


@jax.jit
def double_conv(x_ncl, w1, g1, b1, w2, g2, b2):
    """x_ncl: (N, Cin, L). w1: (Cout, Cin, 3), w2: (Cout, Cout, 3). Returns (N, Cout, L)."""
    N, Cin, L = x_ncl.shape
    Cout = w1.shape[0]
    Cp = max(LANE, ((Cout + LANE - 1) // LANE) * LANE)            # lane-dense padded channels

    # --- plain-JAX layout glue (XLA-fused): channels-last flattened rows; (tap, in, out)
    #     weights with the out-channel (lane) axis zero-padded to Cp; BN params zero-padded.
    x2d = jnp.transpose(x_ncl, (0, 2, 1)).reshape(N * L, Cin).astype(jnp.float32)
    w1_k = jnp.pad(jnp.transpose(w1, (2, 1, 0)).astype(jnp.float32),
                   ((0, 0), (0, 0), (0, Cp - Cout)))                           # (3, Cin, Cp)
    w2cat = jnp.pad(jnp.transpose(w2, (2, 1, 0)).astype(jnp.float32),
                    ((0, 0), (0, Cp - Cout), (0, Cp - Cout))).reshape(3 * Cp, Cp)  # (3*Cp, Cp)
    g1p = jnp.pad(g1.astype(jnp.float32), (0, Cp - Cout))
    b1p = jnp.pad(b1.astype(jnp.float32), (0, Cp - Cout))
    g2p = jnp.pad(g2.astype(jnp.float32), (0, Cp - Cout))
    b2p = jnp.pad(b2.astype(jnp.float32), (0, Cp - Cout))

    vmem_limit = _vmem_limit_bytes()
    Bt = _choose_block_batch(N, L, Cp, vmem_limit)
    G = N // Bt                 # grid steps (batch groups)
    R = Bt * L                  # rows per block (whole batch elements, flattened along L)

    # 0/1 masks that zero the l-1 / l+1 neighbour wherever it crosses a batch-element boundary
    ridx = jnp.arange(R, dtype=jnp.int32) % L
    mprev = (ridx != 0).astype(jnp.float32).reshape(R, 1)
    mnext = (ridx != L - 1).astype(jnp.float32).reshape(R, 1)

    params = pltpu.CompilerParams(dimension_semantics=("parallel",),
                                  vmem_limit_bytes=vmem_limit)

    row_x = pl.BlockSpec((R, Cin), lambda g: (g, 0))
    row_c = pl.BlockSpec((R, Cp), lambda g: (g, 0))
    st_spec = pl.BlockSpec((1, 2, Cp), lambda g: (g, 0, 0))

    def const_spec(shape):      # whole array, same block every step (stays VMEM-resident)
        return pl.BlockSpec(shape, lambda g: (0,) * len(shape))

    # ---- pass 1: conv1 + BN1 partial statistics ---------------------------------------
    h, st1 = pl.pallas_call(
        _conv1_stats_kernel,
        out_shape=(jax.ShapeDtypeStruct((N * L, Cp), jnp.float32),
                   jax.ShapeDtypeStruct((G, 2, Cp), jnp.float32)),
        grid_spec=pltpu.PrefetchScalarGridSpec(
            num_scalar_prefetch=0, grid=(G,),
            in_specs=[row_x, const_spec((R, 1)), const_spec((R, 1)),
                      const_spec((3, Cin, Cp))],
            out_specs=[row_c, st_spec]),
        compiler_params=params,
    )(x2d, mprev, mnext, w1_k)

    scale1, shift1 = _fold_bn(st1, N * L, g1p, b1p)

    # ---- pass 2: BN1+ReLU (folded) -> conv2 (im2col) + BN2 partial statistics ----------
    #      h is aliased onto y (same shape/dtype/index_map) to halve peak HBM residency.
    y, st2 = pl.pallas_call(
        _bn_relu_conv2_stats_kernel,
        out_shape=(jax.ShapeDtypeStruct((N * L, Cp), jnp.float32),
                   jax.ShapeDtypeStruct((G, 2, Cp), jnp.float32)),
        grid_spec=pltpu.PrefetchScalarGridSpec(
            num_scalar_prefetch=0, grid=(G,),
            in_specs=[row_c, const_spec((R, 1)), const_spec((R, 1)),
                      const_spec((1, Cp)), const_spec((1, Cp)),
                      const_spec((3 * Cp, Cp))],
            out_specs=[row_c, st_spec]),
        compiler_params=params,
        input_output_aliases={0: 0},
    )(h, mprev, mnext, scale1, shift1, w2cat)

    scale2, shift2 = _fold_bn(st2, N * L, g2p, b2p)

    # ---- BN2 + ReLU in plain jnp: XLA fuses it with the channel slice + NLC->NCL transpose,
    #      so there is no third full Pallas pass over the activations.
    out2d = jnp.maximum(y * scale2 + shift2, 0.0)                 # (N*L, Cp)
    out_nlc = out2d.reshape(N, L, Cp)[:, :, :Cout]
    return jnp.transpose(out_nlc, (0, 2, 1))                     # (N, Cout, L)


def _reference(x, w1, g1, b1, w2, g2, b2):
    """Pure-JAX reference matching the PyTorch DoubleConv forward (train-mode BN)."""
    def conv(x, w):
        return jax.lax.conv_general_dilated(
            x, w, window_strides=(1,), padding=((1, 1),),
            dimension_numbers=('NCH', 'OIH', 'NCH'))

    def bn_relu(h, g, b):
        mean = h.mean(axis=(0, 2), keepdims=True)
        var = ((h - mean) ** 2).mean(axis=(0, 2), keepdims=True)
        hn = (h - mean) / jnp.sqrt(var + EPS)
        return jnp.maximum(hn * g[None, :, None] + b[None, :, None], 0.0)

    h = bn_relu(conv(x, w1), g1, b1)
    return bn_relu(conv(h, w2), g2, b2)


if __name__ == "__main__":
    N, Cin, Cout, L = 2, 4, 8, 16
    key = jax.random.PRNGKey(0)
    k_x, k_w1, k_w2, k_g1, k_b1, k_g2, k_b2 = jax.random.split(key, 7)

    x = jax.random.normal(k_x, (N, Cin, L), dtype=jnp.float32)
    # nn.Conv1d(in, out, 3, 1, 1, bias=False) weight layout: (out, in, 3)
    w1 = jax.random.normal(k_w1, (Cout, Cin, 3), dtype=jnp.float32) * 0.2
    w2 = jax.random.normal(k_w2, (Cout, Cout, 3), dtype=jnp.float32) * 0.2
    # BatchNorm1d affine params (PyTorch default is ones/zeros; random here for coverage)
    g1 = 1.0 + 0.1 * jax.random.normal(k_g1, (Cout,), dtype=jnp.float32)
    b1 = 0.1 * jax.random.normal(k_b1, (Cout,), dtype=jnp.float32)
    g2 = 1.0 + 0.1 * jax.random.normal(k_g2, (Cout,), dtype=jnp.float32)
    b2 = 0.1 * jax.random.normal(k_b2, (Cout,), dtype=jnp.float32)

    out = jax.block_until_ready(double_conv(x, w1, g1, b1, w2, g2, b2))
    ref = jax.block_until_ready(_reference(x, w1, g1, b1, w2, g2, b2))

    assert out.shape == (N, Cout, L), out.shape
    np.testing.assert_allclose(np.asarray(out), np.asarray(ref), atol=1e-4, rtol=1e-4)
    print("KERNEL_OK")
</pallas_src>

<mosaic_0001>
module attributes {stable_mosaic.version = 11 : i64} {
  func.func @_conv1_stats_kernel(%arg0: i32, %arg1: memref<32x4xf32, #tpu.memory_space<vmem>>, %arg2: memref<32x1xf32, #tpu.memory_space<vmem>>, %arg3: memref<32x1xf32, #tpu.memory_space<vmem>>, %arg4: memref<3x4x128xf32, #tpu.memory_space<vmem>>, %arg5: memref<32x128xf32, #tpu.memory_space<vmem>>, %arg6: memref<1x2x128xf32, #tpu.memory_space<vmem>>) attributes {dimension_semantics = [#tpu.dimension_semantics<parallel>], iteration_bounds = array<i64: 1>, scalar_prefetch = 0 : i64, scratch_operands = 0 : i64, tpu.core_type = #tpu.core_type<tc>, window_params = [{transform_indices = @transform_0, window_bounds = array<i64: 32, 4>}, {pipeline_mode = #tpu.pipeline_mode<synchronous>, transform_indices = @transform_1, window_bounds = array<i64: 32, 1>}, {pipeline_mode = #tpu.pipeline_mode<synchronous>, transform_indices = @transform_2, window_bounds = array<i64: 32, 1>}, {pipeline_mode = #tpu.pipeline_mode<synchronous>, transform_indices = @transform_3, window_bounds = array<i64: 3, 4, 128>}, {transform_indices = @transform_4, window_bounds = array<i64: 32, 128>}, {transform_indices = @transform_5, window_bounds = array<i64: 1, 2, 128>}]} {
    %c0 = arith.constant 0 : index
    %c0_0 = arith.constant 0 : index
    %0 = vector.load %arg1[%c0, %c0_0] : memref<32x4xf32, #tpu.memory_space<vmem>>, vector<32x4xf32>
    %c0_1 = arith.constant 0 : index
    %c0_2 = arith.constant 0 : index
    %1 = vector.load %arg2[%c0_1, %c0_2] : memref<32x1xf32, #tpu.memory_space<vmem>>, vector<32x1xf32>
    %c0_3 = arith.constant 0 : index
    %c0_4 = arith.constant 0 : index
    %2 = vector.load %arg3[%c0_3, %c0_4] : memref<32x1xf32, #tpu.memory_space<vmem>>, vector<32x1xf32>
    %cst = arith.constant 0.000000e+00 : f32
    %3 = vector.broadcast %cst : f32 to vector<1x4xf32>
    %4 = vector.extract_strided_slice %0 {offsets = [0, 0], sizes = [31, 4], strides = [1, 1]} : vector<32x4xf32> to vector<31x4xf32>
    %5 = tpu.concatenate %3, %4 in 0 : vector<1x4xf32>, vector<31x4xf32> -> vector<32x4xf32>
    %6 = vector.broadcast %1 : vector<32x1xf32> to vector<32x4xf32>
    %7 = arith.mulf %5, %6 : vector<32x4xf32>
    %8 = vector.extract_strided_slice %0 {offsets = [1, 0], sizes = [31, 4], strides = [1, 1]} : vector<32x4xf32> to vector<31x4xf32>
    %9 = tpu.concatenate %8, %3 in 0 : vector<31x4xf32>, vector<1x4xf32> -> vector<32x4xf32>
    %10 = vector.broadcast %2 : vector<32x1xf32> to vector<32x4xf32>
    %11 = arith.mulf %9, %10 : vector<32x4xf32>
    %c0_5 = arith.constant 0 : index
    %c0_6 = arith.constant 0 : index
    %c0_7 = arith.constant 0 : index
    %12 = vector.load %arg4[%c0_5, %c0_6, %c0_7] : memref<3x4x128xf32, #tpu.memory_space<vmem>>, vector<1x4x128xf32>
    %13 = vector.shape_cast %12 : vector<1x4x128xf32> to vector<4x128xf32>
    %cst_8 = arith.constant dense<0.000000e+00> : vector<32x128xf32>
    %14 = tpu.matmul %7, %13, %cst_8 {dimension_numbers = #tpu.dot_dimension_numbers<[1], [0], [0], [1], [0, 0, 1, 1], [], []>} : vector<32x4xf32>, vector<4x128xf32>, vector<32x128xf32> -> vector<32x128xf32>
    %c1 = arith.constant 1 : index
    %c0_9 = arith.constant 0 : index
    %c0_10 = arith.constant 0 : index
    %15 = vector.load %arg4[%c1, %c0_9, %c0_10] : memref<3x4x128xf32, #tpu.memory_space<vmem>>, vector<1x4x128xf32>
    %16 = vector.shape_cast %15 : vector<1x4x128xf32> to vector<4x128xf32>
    %cst_11 = arith.constant dense<0.000000e+00> : vector<32x128xf32>
    %17 = tpu.matmul %0, %16, %cst_11 {dimension_numbers = #tpu.dot_dimension_numbers<[1], [0], [0], [1], [0, 0, 1, 1], [], []>} : vector<32x4xf32>, vector<4x128xf32>, vector<32x128xf32> -> vector<32x128xf32>
    %18 = arith.addf %14, %17 : vector<32x128xf32>
    %c2 = arith.constant 2 : index
    %c0_12 = arith.constant 0 : index
    %c0_13 = arith.constant 0 : index
    %19 = vector.load %arg4[%c2, %c0_12, %c0_13] : memref<3x4x128xf32, #tpu.memory_space<vmem>>, vector<1x4x128xf32>
    %20 = vector.shape_cast %19 : vector<1x4x128xf32> to vector<4x128xf32>
    %cst_14 = arith.constant dense<0.000000e+00> : vector<32x128xf32>
    %21 = tpu.matmul %11, %20, %cst_14 {dimension_numbers = #tpu.dot_dimension_numbers<[1], [0], [0], [1], [0, 0, 1, 1], [], []>} : vector<32x4xf32>, vector<4x128xf32>, vector<32x128xf32> -> vector<32x128xf32>
    %22 = arith.addf %18, %21 : vector<32x128xf32>
    %c0_15 = arith.constant 0 : index
    %c0_16 = arith.constant 0 : index
    %23 = vector.load %arg5[%c0_15, %c0_16] : memref<32x128xf32, #tpu.memory_space<vmem>>, vector<32x128xf32>
    tpu.vector_store %arg5[%c0_15, %c0_16], %22 {strides = array<i32>} : memref<32x128xf32, #tpu.memory_space<vmem>>, vector<32x128xf32>,
    %cst_17 = arith.constant dense<0.000000e+00> : vector<128xf32>
    %24 = vector.multi_reduction <add>, %22, %cst_17 [0] : vector<32x128xf32> to vector<128xf32>
    %25 = vector.shape_cast %24 : vector<128xf32> to vector<1x128xf32>
    %26 = arith.mulf %22, %22 : vector<32x128xf32>
    %cst_18 = arith.constant dense<0.000000e+00> : vector<128xf32>
    %27 = vector.multi_reduction <add>, %26, %cst_18 [0] : vector<32x128xf32> to vector<128xf32>
    %28 = vector.shape_cast %27 : vector<128xf32> to vector<1x128xf32>
    %29 = tpu.concatenate %25, %28 in 0 : vector<1x128xf32>, vector<1x128xf32> -> vector<2x128xf32>
    %c0_19 = arith.constant 0 : index
    %c0_20 = arith.constant 0 : index
    %c0_21 = arith.constant 0 : index
    %30 = vector.load %arg6[%c0_19, %c0_20, %c0_21] : memref<1x2x128xf32, #tpu.memory_space<vmem>>, vector<1x2x128xf32>
    %31 = vector.shape_cast %30 : vector<1x2x128xf32> to vector<2x128xf32>
    %32 = vector.shape_cast %29 : vector<2x128xf32> to vector<1x2x128xf32>
    tpu.vector_store %arg6[%c0_19, %c0_20, %c0_21], %32 {strides = array<i32>} : memref<1x2x128xf32, #tpu.memory_space<vmem>>, vector<1x2x128xf32>,
    return
  }
  func.func @transform_0(%arg0: i32) -> (i32, i32) {
    %c0_i32 = arith.constant 0 : i32
    %c0_i32_0 = arith.constant 0 : i32
    return %arg0, %c0_i32 : i32, i32
  }
  func.func @transform_1(%arg0: i32) -> (i32, i32) {
    %c0_i32 = arith.constant 0 : i32
    %c0_i32_0 = arith.constant 0 : i32
    %c0_i32_1 = arith.constant 0 : i32
    return %c0_i32, %c0_i32_0 : i32, i32
  }
  func.func @transform_2(%arg0: i32) -> (i32, i32) {
    %c0_i32 = arith.constant 0 : i32
    %c0_i32_0 = arith.constant 0 : i32
    %c0_i32_1 = arith.constant 0 : i32
    return %c0_i32, %c0_i32_0 : i32, i32
  }
  func.func @transform_3(%arg0: i32) -> (i32, i32, i32) {
    %c0_i32 = arith.constant 0 : i32
    %c0_i32_0 = arith.constant 0 : i32
    %c0_i32_1 = arith.constant 0 : i32
    %c0_i32_2 = arith.constant 0 : i32
    return %c0_i32, %c0_i32_0, %c0_i32_1 : i32, i32, i32
  }
  func.func @transform_4(%arg0: i32) -> (i32, i32) {
    %c0_i32 = arith.constant 0 : i32
    %c0_i32_0 = arith.constant 0 : i32
    return %arg0, %c0_i32 : i32, i32
  }
  func.func @transform_5(%arg0: i32) -> (i32, i32, i32) {
    %c0_i32 = arith.constant 0 : i32
    %c0_i32_0 = arith.constant 0 : i32
    %c0_i32_1 = arith.constant 0 : i32
    return %arg0, %c0_i32, %c0_i32_0 : i32, i32, i32
  }
}

module attributes {stable_mosaic.version = 11 : i64} {
  func.func @_bn_relu_conv2_stats_kernel(%arg0: i32, %arg1: memref<32x128xf32, #tpu.memory_space<vmem>>, %arg2: memref<32x1xf32, #tpu.memory_space<vmem>>, %arg3: memref<32x1xf32, #tpu.memory_space<vmem>>, %arg4: memref<1x128xf32, #tpu.memory_space<vmem>>, %arg5: memref<1x128xf32, #tpu.memory_space<vmem>>, %arg6: memref<384x128xf32, #tpu.memory_space<vmem>>, %arg7: memref<32x128xf32, #tpu.memory_space<vmem>>, %arg8: memref<1x2x128xf32, #tpu.memory_space<vmem>>) attributes {dimension_semantics = [#tpu.dimension_semantics<parallel>], iteration_bounds = array<i64: 1>, scalar_prefetch = 0 : i64, scratch_operands = 0 : i64, tpu.core_type = #tpu.core_type<tc>, window_params = [{transform_indices = @transform_0, window_bounds = array<i64: 32, 128>}, {pipeline_mode = #tpu.pipeline_mode<synchronous>, transform_indices = @transform_1, window_bounds = array<i64: 32, 1>}, {pipeline_mode = #tpu.pipeline_mode<synchronous>, transform_indices = @transform_2, window_bounds = array<i64: 32, 1>}, {pipeline_mode = #tpu.pipeline_mode<synchronous>, transform_indices = @transform_3, window_bounds = array<i64: 1, 128>}, {pipeline_mode = #tpu.pipeline_mode<synchronous>, transform_indices = @transform_4, window_bounds = array<i64: 1, 128>}, {pipeline_mode = #tpu.pipeline_mode<synchronous>, transform_indices = @transform_5, window_bounds = array<i64: 384, 128>}, {transform_indices = @transform_6, window_bounds = array<i64: 32, 128>}, {transform_indices = @transform_7, window_bounds = array<i64: 1, 2, 128>}]} {
    %c0 = arith.constant 0 : index
    %c0_0 = arith.constant 0 : index
    %0 = vector.load %arg1[%c0, %c0_0] : memref<32x128xf32, #tpu.memory_space<vmem>>, vector<32x128xf32>
    %c0_1 = arith.constant 0 : index
    %c0_2 = arith.constant 0 : index
    %1 = vector.load %arg4[%c0_1, %c0_2] : memref<1x128xf32, #tpu.memory_space<vmem>>, vector<1x128xf32>
    %2 = vector.broadcast %1 : vector<1x128xf32> to vector<32x128xf32>
    %3 = arith.mulf %0, %2 : vector<32x128xf32>
    %c0_3 = arith.constant 0 : index
    %c0_4 = arith.constant 0 : index
    %4 = vector.load %arg5[%c0_3, %c0_4] : memref<1x128xf32, #tpu.memory_space<vmem>>, vector<1x128xf32>
    %5 = vector.broadcast %4 : vector<1x128xf32> to vector<32x128xf32>
    %6 = arith.addf %3, %5 : vector<32x128xf32>
    %cst = arith.constant 0.000000e+00 : f32
    %7 = vector.broadcast %cst : f32 to vector<32x128xf32>
    %8 = arith.maximumf %6, %7 : vector<32x128xf32>
    %c0_5 = arith.constant 0 : index
    %c0_6 = arith.constant 0 : index
    %9 = vector.load %arg2[%c0_5, %c0_6] : memref<32x1xf32, #tpu.memory_space<vmem>>, vector<32x1xf32>
    %c0_7 = arith.constant 0 : index
    %c0_8 = arith.constant 0 : index
    %10 = vector.load %arg3[%c0_7, %c0_8] : memref<32x1xf32, #tpu.memory_space<vmem>>, vector<32x1xf32>
    %cst_9 = arith.constant 0.000000e+00 : f32
    %11 = vector.broadcast %cst_9 : f32 to vector<1x128xf32>
    %12 = vector.extract_strided_slice %8 {offsets = [0, 0], sizes = [31, 128], strides = [1, 1]} : vector<32x128xf32> to vector<31x128xf32>
    %13 = tpu.concatenate %11, %12 in 0 : vector<1x128xf32>, vector<31x128xf32> -> vector<32x128xf32>
    %14 = vector.broadcast %9 : vector<32x1xf32> to vector<32x128xf32>
    %15 = arith.mulf %13, %14 : vector<32x128xf32>
    %16 = vector.extract_strided_slice %8 {offsets = [1, 0], sizes = [31, 128], strides = [1, 1]} : vector<32x128xf32> to vector<31x128xf32>
    %17 = tpu.concatenate %16, %11 in 0 : vector<31x128xf32>, vector<1x128xf32> -> vector<32x128xf32>
    %18 = vector.broadcast %10 : vector<32x1xf32> to vector<32x128xf32>
    %19 = arith.mulf %17, %18 : vector<32x128xf32>
    %20 = tpu.concatenate %15, %8, %19 in 1 : vector<32x128xf32>, vector<32x128xf32>, vector<32x128xf32> -> vector<32x384xf32>
    %c0_10 = arith.constant 0 : index
    %c0_11 = arith.constant 0 : index
    %21 = vector.load %arg6[%c0_10, %c0_11] : memref<384x128xf32, #tpu.memory_space<vmem>>, vector<384x128xf32>
    %cst_12 = arith.constant dense<0.000000e+00> : vector<32x128xf32>
    %22 = tpu.matmul %20, %21, %cst_12 {dimension_numbers = #tpu.dot_dimension_numbers<[1], [0], [0], [1], [0, 0, 1, 1], [], []>} : vector<32x384xf32>, vector<384x128xf32>, vector<32x128xf32> -> vector<32x128xf32>
    %c0_13 = arith.constant 0 : index
    %c0_14 = arith.constant 0 : index
    %23 = vector.load %arg7[%c0_13, %c0_14] : memref<32x128xf32, #tpu.memory_space<vmem>>, vector<32x128xf32>
    tpu.vector_store %arg7[%c0_13, %c0_14], %22 {strides = array<i32>} : memref<32x128xf32, #tpu.memory_space<vmem>>, vector<32x128xf32>,
    %cst_15 = arith.constant dense<0.000000e+00> : vector<128xf32>
    %24 = vector.multi_reduction <add>, %22, %cst_15 [0] : vector<32x128xf32> to vector<128xf32>
    %25 = vector.shape_cast %24 : vector<128xf32> to vector<1x128xf32>
    %26 = arith.mulf %22, %22 : vector<32x128xf32>
    %cst_16 = arith.constant dense<0.000000e+00> : vector<128xf32>
    %27 = vector.multi_reduction <add>, %26, %cst_16 [0] : vector<32x128xf32> to vector<128xf32>
    %28 = vector.shape_cast %27 : vector<128xf32> to vector<1x128xf32>
    %29 = tpu.concatenate %25, %28 in 0 : vector<1x128xf32>, vector<1x128xf32> -> vector<2x128xf32>
    %c0_17 = arith.constant 0 : index
    %c0_18 = arith.constant 0 : index
    %c0_19 = arith.constant 0 : index
    %30 = vector.load %arg8[%c0_17, %c0_18, %c0_19] : memref<1x2x128xf32, #tpu.memory_space<vmem>>, vector<1x2x128xf32>
    %31 = vector.shape_cast %30 : vector<1x2x128xf32> to vector<2x128xf32>
    %32 = vector.shape_cast %29 : vector<2x128xf32> to vector<1x2x128xf32>
    tpu.vector_store %arg8[%c0_17, %c0_18, %c0_19], %32 {strides = array<i32>} : memref<1x2x128xf32, #tpu.memory_space<vmem>>, vector<1x2x128xf32>,
    return
  }
  func.func @transform_0(%arg0: i32) -> (i32, i32) {
    %c0_i32 = arith.constant 0 : i32
    %c0_i32_0 = arith.constant 0 : i32
    return %arg0, %c0_i32 : i32, i32
  }
  func.func @transform_1(%arg0: i32) -> (i32, i32) {
    %c0_i32 = arith.constant 0 : i32
    %c0_i32_0 = arith.constant 0 : i32
    %c0_i32_1 = arith.constant 0 : i32
    return %c0_i32, %c0_i32_0 : i32, i32
  }
  func.func @transform_2(%arg0: i32) -> (i32, i32) {
    %c0_i32 = arith.constant 0 : i32
    %c0_i32_0 = arith.constant 0 : i32
    %c0_i32_1 = arith.constant 0 : i32
    return %c0_i32, %c0_i32_0 : i32, i32
  }
  func.func @transform_3(%arg0: i32) -> (i32, i32) {
    %c0_i32 = arith.constant 0 : i32
    %c0_i32_0 = arith.constant 0 : i32
    %c0_i32_1 = arith.constant 0 : i32
    return %c0_i32, %c0_i32_0 : i32, i32
  }
  func.func @transform_4(%arg0: i32) -> (i32, i32) {
    %c0_i32 = arith.constant 0 : i32
    %c0_i32_0 = arith.constant 0 : i32
    %c0_i32_1 = arith.constant 0 : i32
    return %c0_i32, %c0_i32_0 : i32, i32
  }
  func.func @transform_5(%arg0: i32) -> (i32, i32) {
    %c0_i32 = arith.constant 0 : i32
    %c0_i32_0 = arith.constant 0 : i32
    %c0_i32_1 = arith.constant 0 : i32
    return %c0_i32, %c0_i32_0 : i32, i32
  }
  func.func @transform_6(%arg0: i32) -> (i32, i32) {
    %c0_i32 = arith.constant 0 : i32
    %c0_i32_0 = arith.constant 0 : i32
    return %arg0, %c0_i32 : i32, i32
  }
  func.func @transform_7(%arg0: i32) -> (i32, i32, i32) {
    %c0_i32 = arith.constant 0 : i32
    %c0_i32_0 = arith.constant 0 : i32
    %c0_i32_1 = arith.constant 0 : i32
    return %arg0, %c0_i32, %c0_i32_0 : i32, i32, i32
  }
}

</mosaic_0001>

<bundles_post_ra>
// kernel: double_conv.3
= control target key start
LH: loop header
LB: loop body
LE: loop exit
PB: predicated region body
PF: predicated region fallthrough
CT: control target
= control target key end

     0   :  { %v328_v0 = vmov 0   ;;  %vm98_vm0 = vcmask 1046528   ;;  %vm61_vm1 = vcmask 1040384   ;;  %s584_s2 = inlined_call_operand.vmem [shape: f32[32,1], index: 2, kind: input, shape index: {}]   ;;  %s585_s5 = inlined_call_operand.vmem [shape: f32[384,128], index: 5, kind: input, shape index: {}]   ;;  %s586_s1 = inlined_call_operand.vmem [shape: f32[32,1], index: 1, kind: input, shape index: {}]   ;;  %s587_s3 = inlined_call_operand.vmem [shape: f32[1,128], index: 3, kind: input, shape index: {}]   ;;  %s588_s4 = inlined_call_operand.vmem [shape: f32[1,128], index: 4, kind: input, shape index: {}]   ;;  %s589_s0 = inlined_call_operand.vmem [shape: f32[32,128], index: 0, kind: input, shape index: {}, may-alias: {0,6}]   ;;  %s590_s6 = inlined_call_operand.vmem [shape: f32[32,128], index: 6, kind: output, shape index: {0}, may-alias: {0,6}]   ;;  %s591_s7 = inlined_call_operand.vmem [shape: f32[1,2,128], index: 7, kind: output, shape index: {1}]  }
   0x1   :  { %324 = vset.pattern.permute.xlu1 %v328_v0  ;;  %323 = vset.pattern.permute.xlu0 %v328_v0  ;;  %v54_v1 = vld [vmem:[%s584_s2 + $0x8] sm:$0xff]  ;;  %v53_v2 = vld [vmem:[%s584_s2] sm:$0xff]  ;;  %v55_v3 = vld [vmem:[%s584_s2 + $0x10] sm:$0xff] }
   0x2   :  { %118 = vperm.xlu1 %324, %v54_v1   ;;  %113 = vperm.xlu0 %323, %v53_v2   ;;  %v182_v4 = vld [vmem:[%s585_s5 + $0x178] sm:$0xff]  ;;  %v181_v5 = vld [vmem:[%s585_s5 + $0x170] sm:$0xff]  ;;  %v180_v7 = vld [vmem:[%s585_s5 + $0x168] sm:$0xff] }
   0x3   :  { %325 = vset.pattern.permute.xlu2 %v328_v0  ;;  %241 = vmatpush.msra.mxu2 %v182_v4  ;;  %v166_v6 = vld [vmem:[%s585_s5 + $0xf8] sm:$0xff]  ;;  %v165_v9 = vld [vmem:[%s585_s5 + $0xf0] sm:$0xff]  ;;  %v164_v11 = vld [vmem:[%s585_s5 + $0xe8] sm:$0xff] }
   0x4   :  { %123 = vperm.xlu2 %325, %v55_v3   ;;  %212 = vmatpush.msra.mxu1 %v166_v6  ;;  %v150_v8 = vld [vmem:[%s585_s5 + $0x78] sm:$0xff]  ;;  %v149_v10 = vld [vmem:[%s585_s5 + $0x70] sm:$0xff]  ;;  %v50_v13 = vld [vmem:[%s586_s1 + $0x8] sm:$0xff] }
   0x5   :  { %242 = vmatpush.msra.mxu2 %v181_v5  ;;  %306 = vmatpush.msra.mxu3 %v150_v8  ;;  %v51_v12 = vld [vmem:[%s586_s1 + $0x10] sm:$0xff]  ;;  %v179_v14 = vld [vmem:[%s585_s5 + $0x160] sm:$0xff]  ;;  %v148_v15 = vld [vmem:[%s585_s5 + $0x68] sm:$0xff] }
   0x6   :  { %213 = vmatpush.msra.mxu1 %v165_v9  ;;  %183 = vmatpush.msra.mxu0 %v150_v8  ;;  %v52_v16 = vld [vmem:[%s586_s1 + $0x18] sm:$0xff]  ;;  %v163_v17 = vld [vmem:[%s585_s5 + $0xe0] sm:$0xff]  ;;  %v177_v21 = vld [vmem:[%s585_s5 + $0x150] sm:$0xff] }
   0x7   :  { %243 = vmatpush.msra.mxu2 %v180_v7  ;;  %307 = vmatpush.msra.mxu3 %v149_v10  ;;  %v178_v18 = vld [vmem:[%s585_s5 + $0x158] sm:$0xff]  ;;  %v147_v19 = vld [vmem:[%s585_s5 + $0x60] sm:$0xff]  ;;  %v161_v23 = vld [vmem:[%s585_s5 + $0xd0] sm:$0xff] }
   0x8   :  { %214 = vmatpush.msra.mxu1 %v164_v11  ;;  %184 = vmatpush.msra.mxu0 %v149_v10  ;;  %v162_v20 = vld [vmem:[%s585_s5 + $0xd8] sm:$0xff]  ;;  %v176_v24 = vld [vmem:[%s585_s5 + $0x148] sm:$0xff]  ;;  %v145_v25 = vld [vmem:[%s585_s5 + $0x50] sm:$0xff] }
   0x9   :  { %244 = vmatpush.msra.mxu2 %v179_v14  ;;  %308 = vmatpush.msra.mxu3 %v148_v15  ;;  %v146_v22 = vld [vmem:[%s585_s5 + $0x58] sm:$0xff]  ;;  %v49_v27 = vld [vmem:[%s586_s1] sm:$0xff]  ;;  %v160_v29 = vld [vmem:[%s585_s5 + $0xc8] sm:$0xff] }
   0xa   :  { %86 = vperm.xlu1 %324, %v51_v12   ;;  %81 = vperm.xlu0 %323, %v50_v13   ;;  %v56_v26 = vld [vmem:[%s584_s2 + $0x18] sm:$0xff]  ;;  %v175_v28 = vld [vmem:[%s585_s5 + $0x140] sm:$0xff]  ;;  %v144_v30 = vld [vmem:[%s585_s5 + $0x48] sm:$0xff] }
   0xb   :  { %215 = vmatpush.msra.mxu1 %v163_v17  ;;  %245 = vmatpush.msra.mxu2 %v178_v18  ;;  %v174_v31 = vld [vmem:[%s585_s5 + $0x138] sm:$0xff]  ;;  %v159_v32 = vld [vmem:[%s585_s5 + $0xc0] sm:$0xff]  ;;  %v173_v34 = vld [vmem:[%s585_s5 + $0x130] sm:$0xff] }
   0xc   :  { %91 = vperm.xlu2 %325, %v52_v16   ;;  %309 = vmatpush.msra.mxu3 %v147_v19  ;;  %v143_v33 = vld [vmem:[%s585_s5 + $0x40] sm:$0xff]  ;;  %v158_v35 = vld [vmem:[%s585_s5 + $0xb8] sm:$0xff]  ;;  %v172_v37 = vld [vmem:[%s585_s5 + $0x128] sm:$0xff] }
   0xd   :  { %216 = vmatpush.msra.mxu1 %v162_v20  ;;  %185 = vmatpush.msra.mxu0 %v148_v15  ;;  %v142_v36 = vld [vmem:[%s585_s5 + $0x38] sm:$0xff]  ;;  %v157_v38 = vld [vmem:[%s585_s5 + $0xb0] sm:$0xff]  ;;  %v171_v40 = vld [vmem:[%s585_s5 + $0x120] sm:$0xff] }
   0xe   :  { %246 = vmatpush.msra.mxu2 %v177_v21  ;;  %310 = vmatpush.msra.mxu3 %v146_v22  ;;  %v141_v39 = vld [vmem:[%s585_s5 + $0x30] sm:$0xff]  ;;  %v156_v41 = vld [vmem:[%s585_s5 + $0xa8] sm:$0xff]  ;;  %v170_v43 = vld [vmem:[%s585_s5 + $0x118] sm:$0xff] }
   0xf   :  { %217 = vmatpush.msra.mxu1 %v161_v23  ;;  %186 = vmatpush.msra.mxu0 %v147_v19  ;;  %v140_v42 = vld [vmem:[%s585_s5 + $0x28] sm:$0xff]  ;;  %v155_v44 = vld [vmem:[%s585_s5 + $0xa0] sm:$0xff]  ;;  %v169_v45 = vld [vmem:[%s585_s5 + $0x110] sm:$0xff] }
  0x10   :  { %247 = vmatpush.msra.mxu2 %v176_v24  ;;  %311 = vmatpush.msra.mxu3 %v145_v25  ;;  %v168_v46 = vld [vmem:[%s585_s5 + $0x108] sm:$0xff]  ;;  %v326_v47 = vld [vmem:[%s587_s3] ss:$0 sm:$0xff]  ;;  %v27_v59 = vld [vmem:[%s589_s0 + $0x10] sm:$0xff] }
  0x11   :  { %218 = vmatpush.msra.mxu1 %v160_v29  ;;  %187 = vmatpush.msra.mxu0 %v146_v22  ;;  %v327_v48 = vld [vmem:[%s588_s4] ss:$0 sm:$0xff]  ;;  %v26_v49 = vld [vmem:[%s589_s0 + $0x8] sm:$0xff]  ;;  %v35_v60 = vmul.f32 %v326_v47, %v27_v59  ;;  %v154_v63 = vld [vmem:[%s585_s5 + $0x98] sm:$0xff] }
  0x12   :  { %128 = vperm.xlu1 %324, %v56_v26   ;;  %76 = vperm.xlu0 %323, %v49_v27   ;;  %v25_v50 = vld [vmem:[%s589_s0] sm:$0xff]  ;;  %v34_v51 = vmul.f32 %v326_v47, %v26_v49  ;;  %v138_v2 = vld [vmem:[%s585_s5 + $0x18] sm:$0xff]  ;;  %v153_v3 = vld [vmem:[%s585_s5 + $0x90] sm:$0xff] }
  0x13   :  { %248 = vmatpush.msra.mxu2 %v175_v28  ;;  %312 = vmatpush.msra.mxu3 %v144_v30  ;;  %v33_v52 = vmul.f32 %v326_v47, %v25_v50  ;;  %v139_v62 = vld [vmem:[%s585_s5 + $0x20] sm:$0xff]  ;;  %v43_v1 = vadd.f32 %v327_v48, %v35_v60  ;;  %v137_v4 = vld [vmem:[%s585_s5 + $0x10] sm:$0xff]  ;;  %v152_v6 = vld [vmem:[%s585_s5 + $0x88] sm:$0xff] }
  0x14   :  { %219 = vmatpush.msra.mxu1 %v159_v32  ;;  %188 = vmatpush.msra.mxu0 %v145_v25  ;;  %v42_v53 = vadd.f32 %v327_v48, %v34_v51  ;;  %v167_v0 = vld [vmem:[%s585_s5 + $0x100] sm:$0xff]  ;;  %v136_v7 = vld [vmem:[%s585_s5 + $0x8] sm:$0xff]  ;;  %v28_v9 = vld [vmem:[%s589_s0 + $0x18] sm:$0xff] }
  0x15   :  { %249 = vmatpush.msra.mxu2 %v174_v31  ;;  %313 = vmatpush.msra.mxu3 %v143_v33  ;;  %v41_v54 = vadd.f32 %v327_v48, %v33_v52  ;;  %v47_v5 = vmax.f32 %v43_v1, 0.0  ;;  %v151_v8 = vld [vmem:[%s585_s5 + $0x80] sm:$0xff]  ;;  %v36_v11 = vmul.f32 %v326_v47, %v28_v9 }
  0x16   :  { %220 = vmatpush.msra.mxu1 %v158_v35  ;;  %189 = vmatpush.msra.mxu0 %v144_v30  ;;  %v46_v55 = vmax.f32 %v42_v53, 0.0  ;;  %v135_v19 = vld [vmem:[%s585_s5] sm:$0xff] }
  0x17   :  { %250 = vmatpush.msra.mxu2 %v173_v34  ;;  %314 = vmatpush.msra.mxu3 %v142_v36  ;;  %v519_v56 = vmax.f32 %v41_v54, 0.0  ;;  %v102_v10 = vrot.slane %v47_v5, 1  ;;  %v65_v13 = vrot.slane %v47_v5, 7  ;;  %v44_v16 = vadd.f32 %v327_v48, %v36_v11 }
  0x18   :  { %221 = vmatpush.msra.mxu1 %v157_v38  ;;  %190 = vmatpush.msra.mxu0 %v143_v33  ;;  %v100_v57 = vrot.slane %v46_v55, 1  ;;  %v63_v12 = vrot.slane %v46_v55, 7 }
  0x19   :  { %251 = vmatpush.msra.mxu2 %v172_v37  ;;  %315 = vmatpush.msra.mxu3 %v141_v39  ;;  %v99_v58 = vrot.slane %v519_v56, 1  ;;  %v62_v14 = vrot.slane %v519_v56, 7  ;;  %v48_v20 = vmax.f32 %v44_v16, 0.0 }
  0x1a   :  { %222 = vmatpush.msra.mxu1 %v156_v41  ;;  %191 = vmatpush.msra.mxu0 %v142_v36  ;;  %v103_v15 = vsel %vm98_vm0, %v100_v57, %v102_v10  ;;  %v66_v17 = vsel %vm61_vm1, %v63_v12, %v65_v13 }
  0x1b   :  { %252 = vmatpush.msra.mxu2 %v171_v40  ;;  %316 = vmatpush.msra.mxu3 %v140_v42  ;;  %v101_v61 = vsel %vm98_vm0, %v99_v58, %v100_v57  ;;  %v64_v18 = vsel %vm61_vm1, %v62_v14, %v63_v12  ;;  %v104_v21 = vrot.slane %v48_v20, 1  ;;  %v67_v22 = vrot.slane %v48_v20, 7 }
  0x1c   :  { %223 = vmatpush.msra.mxu1 %v155_v44  ;;  %192 = vmatpush.msra.mxu0 %v141_v39  ;;  %v73_v33 = vsel %vm61_vm1, 0.0, %v62_v14 }
  0x1d   :  { %253 = vmatpush.msra.mxu2 %v170_v43  ;;  %317 = vmatpush.msra.mxu3 %v139_v62  ;;  %v105_v23 = vsel %vm98_vm0, %v102_v10, %v104_v21  ;;  %v68_v24 = vsel %vm61_vm1, %v65_v13, %v67_v22  ;;  %v110_v40 = vsel %vm98_vm0, %v104_v21, 0.0 }
  0x1e   :  { %193 = vmatpush.msra.mxu0 %v140_v42  ;;  %224 = vmatpush.msra.mxu1 %v154_v63 }
  0x1f   :  { %254 = vmatpush.msra.mxu2 %v169_v45  ;;  %318 = vmatpush.msra.mxu3 %v138_v2 }
  0x20   :  { %194 = vmatpush.msra.mxu0 %v139_v62  ;;  %225 = vmatpush.msra.mxu1 %v153_v3 }
  0x21   :  { %255 = vmatpush.msra.mxu2 %v168_v46  ;;  %319 = vmatpush.msra.mxu3 %v137_v4 }
  0x22   :  { %195 = vmatpush.msra.mxu0 %v138_v2  ;;  %226 = vmatpush.msra.mxu1 %v152_v6 }
  0x23   :  { %256 = vmatpush.msra.mxu2 %v167_v0  ;;  %320 = vmatpush.msra.mxu3 %v136_v7 }
  0x24   :  { %196 = vmatpush.msra.mxu0 %v137_v4  ;;  %227 = vmatpush.msra.mxu1 %v151_v8 }
  0x25   :  { %228 = vmatmul.f32.vlgmr.msra.gmra.mxu1 %v519_v56  ;;  %321 = vmatpush.msra.mxu3 %v135_v19 }
  0x26   :  { %197 = vmatpush.msra.mxu0 %v136_v7 }
  0x28   :  { %198 = vmatpush.msra.mxu0 %v135_v19 }
  0x2d   :  { %231 = vmatmul.f32.gmra.mxu1 %v46_v55 }
  0x35   :  { %234 = vmatmul.f32.gmra.mxu1 %v47_v5 }
  0x3d   :  { %237 = vmatmul.f32.gmra.mxu1 %v48_v20 }
  0x5e   :  { %v124_v31 = vpop.permute.xlu2 %123 }
  0x5f   :  { %v133_v34 = vmul.f32 %v124_v31, %v105_v23 }
  0x66   :  { %v92_v38 = vpop.permute.xlu2 %91 }
  0x67   :  { %v97_v41 = vmul.f32 %v92_v38, %v68_v24 }
  0x74   :  { %v114_v25 = vpop.permute.xlu0 %113  ;;  %v119_v27 = vpop.permute.xlu1 %118 }
  0x75   :  { %v131_v26 = vmul.f32 %v114_v25, %v101_v61  ;;  %v132_v28 = vmul.f32 %v119_v27, %v103_v15 }
  0x77   :  { %257 = vmatmul.f32.vlgmr.msra.gmra.mxu2 %v131_v26 }
  0x7c   :  { %v82_v29 = vpop.permute.xlu0 %81  ;;  %v87_v32 = vpop.permute.xlu1 %86 }
  0x7d   :  { %v95_v30 = vmul.f32 %v82_v29, %v64_v18  ;;  %v96_v36 = vmul.f32 %v87_v32, %v66_v17 }
  0x7f   :  { %202 = vmatmul.f32.vlgmr.msra.gmra.mxu3 %v95_v30  ;;  %260 = vmatmul.f32.gmra.mxu2 %v132_v28 }
  0x84   :  { %v77_v35 = vpop.permute.xlu0 %76  ;;  %v129_v39 = vpop.permute.xlu1 %128 }
  0x85   :  { %v94_v37 = vmul.f32 %v77_v35, %v73_v33  ;;  %v134_v42 = vmul.f32 %v129_v39, %v110_v40 }
  0x87   :  { %199 = vmatmul.f32.vlgmr.msra.gmra.mxu0 %v94_v37  ;;  %205 = vmatmul.f32.gmra.mxu3 %v96_v36 }
  0x88   :  { %263 = vmatmul.f32.gmra.mxu2 %v133_v34 }
  0x8f   :  { %208 = vmatmul.f32.gmra.mxu3 %v97_v41 }
  0x90   :  { %266 = vmatmul.f32.gmra.mxu2 %v134_v42 }
  0xa2   :  { %v229_v43 = vpop.f32.mrf.mxu1 }
  0xaa   :  { %v232_v45 = vpop.f32.mrf.mxu1 }
  0xb2   :  { %v235_v52 = vpop.f32.mrf.mxu1 }
  0xba   :  { %v238_v58 = vpop.f32.mrf.mxu1 }
  0xfa   :  { %v258_v44 = vpop.f32.mrf.mxu2 }
 0x102   :  { %v203_v46 = vpop.f32.mrf.mxu3  ;;  %v261_v47 = vpop.f32.mrf.mxu2 }
 0x103   :  { %v233_v48 = vadd.f32 %v232_v45, %v203_v46 }
 0x104   :  { %v200_v49 = vpop.f32.mrf.mxu0 }
 0x105   :  { %v262_v50 = vadd.f32 %v261_v47, %v233_v48  ;;  %v230_v51 = vadd.f32 %v229_v43, %v200_v49 }
 0x107   :  { %271 = vst [vmem:[%s590_s6 + $0x8] sm:$0xff] %v262_v50  ;;  %v259_v53 = vadd.f32 %v258_v44, %v230_v51  ;;  %v284_v61 = vmul.f32 %v262_v50, %v262_v50 }
 0x109   :  { %270 = vst [vmem:[%s590_s6] sm:$0xff] %v259_v53  ;;  %v283_v59 = vmul.f32 %v259_v53, %v259_v53  ;;  %v274_v62 = vadd.f32 %v262_v50, %v259_v53 }
 0x10a   :  { %v206_v54 = vpop.f32.mrf.mxu3 }
 0x10b   :  { %v236_v55 = vadd.f32 %v235_v52, %v206_v54  ;;  %v264_v56 = vpop.f32.mrf.mxu2  ;;  %v287_v3 = vadd.f32 %v284_v61, %v283_v59 }
 0x10d   :  { %v265_v57 = vadd.f32 %v264_v56, %v236_v55 }
 0x10f   :  { %272 = vst [vmem:[%s590_s6 + $0x10] sm:$0xff] %v265_v57  ;;  %v285_v63 = vmul.f32 %v265_v57, %v265_v57  ;;  %v275_v2 = vadd.f32 %v274_v62, %v265_v57 }
 0x111   :  { %v288_v5 = vadd.f32 %v287_v3, %v285_v63 }
 0x112   :  { %v209_v60 = vpop.f32.mrf.mxu3 }
 0x113   :  { %v239_v0 = vadd.f32 %v238_v58, %v209_v60  ;;  %v267_v1 = vpop.f32.mrf.mxu2 }
 0x115   :  { %v268_v4 = vadd.f32 %v267_v1, %v239_v0 }
 0x117   :  { %273 = vst [vmem:[%s590_s6 + $0x18] sm:$0xff] %v268_v4  ;;  %v276_v6 = vadd.f32 %v275_v2, %v268_v4  ;;  %v286_v7 = vmul.f32 %v268_v4, %v268_v4 }
 0x119   :  { %v277_v8 = vrot.slane %v276_v6, 4  ;;  %v289_v9 = vadd.f32 %v288_v5, %v286_v7 }
 0x11b   :  { %v278_v10 = vadd.f32 %v277_v8, %v276_v6  ;;  %v290_v11 = vrot.slane %v289_v9, 4 }
 0x11d   :  { %v279_v12 = vrot.slane %v278_v10, 2  ;;  %v291_v13 = vadd.f32 %v290_v11, %v289_v9 }
 0x11f   :  { %v280_v14 = vadd.f32 %v279_v12, %v278_v10  ;;  %v292_v15 = vrot.slane %v291_v13, 2 }
 0x121   :  { %v281_v16 = vrot.slane %v280_v14, 1  ;;  %v293_v17 = vadd.f32 %v292_v15, %v291_v13 }
 0x123   :  { %v294_v18 = vrot.slane %v293_v17, 1  ;;  %v282_v19 = vadd.f32 %v281_v16, %v280_v14 }
 0x125   :  { %v295_v20 = vadd.f32 %v294_v18, %v293_v17 }
 0x127   :  { %v296_v21 = vsel %vm61_vm1, %v282_v19, %v295_v20 }
 0x128   :  { %297 = vst [vmem:[%s591_s7] sm:$0x3] %v296_v21 }

// kernel: double_conv.2
= control target key start
LH: loop header
LB: loop body
LE: loop exit
PB: predicated region body
PF: predicated region fallthrough
CT: control target
= control target key end

     0   :  { %v308_v0 = vmov 0   ;;  %vm121_vm0 = vcmask 1043456   ;;  %vm112_vm1 = vcmask 31744   ;;  %vm72_vm2 = vcmask 1046528   ;;  %s420_s2 = inlined_call_operand.vmem [shape: f32[32,1], index: 2, kind: input, shape index: {}]   ;;  %s421_s1 = inlined_call_operand.vmem [shape: f32[32,1], index: 1, kind: input, shape index: {}]   ;;  %s422_s3 = inlined_call_operand.vmem [shape: f32[3,4,128], index: 3, kind: input, shape index: {}]   ;;  %s423_s0 = inlined_call_operand.vmem [shape: f32[32,4], index: 0, kind: input, shape index: {}]   ;;  %s424_s4 = inlined_call_operand.vmem [shape: f32[32,128], index: 4, kind: output, shape index: {0}]   ;;  %s425_s5 = inlined_call_operand.vmem [shape: f32[1,2,128], index: 5, kind: output, shape index: {1}]  }
   0x1   :  { %306 = vset.pattern.permute.xlu1 %v308_v0  ;;  %305 = vset.pattern.permute.xlu0 %v308_v0  ;;  %v29_v1 = vld [vmem:[%s420_s2 + $0x10] sm:$0xff]  ;;  %v28_v2 = vld [vmem:[%s420_s2 + $0x8] sm:$0xff]  ;;  %v23_v5 = vld [vmem:[%s421_s1] sm:$0xff]  ;;  %vm35_vm3 = vcmask 1040384  }
   0x2   :  { %97 = vperm.xlu1 %306, %v29_v1   ;;  %92 = vperm.xlu0 %305, %v28_v2   ;;  %v25_v3 = vld [vmem:[%s421_s1 + $0x10] sm:$0xff]  ;;  %v24_v4 = vld [vmem:[%s421_s1 + $0x8] sm:$0xff]  ;;  %v30_v6 = vld [vmem:[%s420_s2 + $0x18] sm:$0xff] }
   0x3   :  { %307 = vset.pattern.permute.xlu2 %v308_v0  ;;  %v27_v7 = vld [vmem:[%s420_s2] sm:$0xff]  ;;  %v26_v8 = vld [vmem:[%s421_s1 + $0x18] sm:$0xff]  ;;  %v295_v10 = vld [vmem:[%s422_s3 + $0x8] sm:$0xf] }
   0x4   :  { %60 = vperm.xlu2 %307, %v25_v3   ;;  %v284_v9 = vld [vmem:[%s422_s3 + $0x4] sm:$0xf]  ;;  %303 = vmatpush.msk.msra.mxu2 %vm121_vm0, %v295_v10  ;;  %v20_v12 = vld [vmem:[%s423_s0 + $0x8] sm:$0xff]  ;;  %v109_v13 = vld [vmem:[%s422_s3] sm:$0xf] }
   0x5   :  { %285 = vmatpush.msk.msra.mxu0 %vm121_vm0, %v284_v9  ;;  %v19_v11 = vld [vmem:[%s423_s0] sm:$0xff]  ;;  %301 = vmatpush.msk.msra.mxu3 %vm121_vm0, %v284_v9  ;;  %v21_v14 = vld [vmem:[%s423_s0 + $0x10] sm:$0xff]  ;;  %v22_v15 = vld [vmem:[%s423_s0 + $0x18] sm:$0xff]  ;;  %v74_v17 = vrot.slane %v20_v12, 1  ;;  %v37_v23 = vrot.slane %v20_v12, 7 }
   0x6   :  { %286 = vmatmul.msk.f32.vlgmr.msra.gmra.mxu0 %vm112_vm1, %v19_v11  ;;  %287 = vmatmul.msk.f32.vlgmr.msra.gmra.mxu3 %vm112_vm1, %v20_v12  ;;  %v76_v16 = vrot.slane %v21_v14, 1  ;;  %v36_v22 = vrot.slane %v19_v11, 7  ;;  %v78_v24 = vrot.slane %v22_v15, 1  ;;  %v73_v34 = vrot.slane %v19_v11, 1 }
   0x7   :  { %290 = vmatpush.msk.msrb.mxu0 %vm121_vm0, %v109_v13  ;;  %302 = vmatpush.msk.msra.mxu1 %vm121_vm0, %v109_v13  ;;  %v39_v35 = vrot.slane %v21_v14, 7  ;;  %v41_v44 = vrot.slane %v22_v15, 7 }
   0x8   :  { %v77_v18 = vsel %vm72_vm2, %v74_v17, %v76_v16  ;;  %v38_v26 = vsel %vm35_vm3, %v36_v22, %v37_v23  ;;  %v47_v27 = vsel %vm35_vm3, 0.0, %v36_v22  ;;  %v79_v28 = vsel %vm72_vm2, %v76_v16, %v78_v24 }
   0x9   :  { %296 = vmatpush.msk.msra.mxu0 %vm121_vm0, %v295_v10  ;;  %v40_v36 = vsel %vm35_vm3, %v37_v23, %v39_v35  ;;  %v75_v37 = vsel %vm72_vm2, %v73_v34, %v74_v17  ;;  %v84_v39 = vsel %vm72_vm2, %v78_v24, 0.0  ;;  %v42_v46 = vsel %vm35_vm3, %v39_v35, %v41_v44 }
   0xa   :  { %55 = vperm.xlu0 %305, %v24_v4   ;;  %50 = vperm.xlu1 %306, %v23_v5  }
   0xc   :  { %102 = vperm.xlu2 %307, %v30_v6  }
   0xe   :  { %288 = vmatmul.msk.f32.gmra.mxu3 %vm112_vm1, %v21_v14 }
  0x12   :  { %87 = vperm.xlu0 %305, %v27_v7   ;;  %65 = vperm.xlu1 %306, %v26_v8  }
  0x16   :  { %289 = vmatmul.msk.f32.gmra.mxu3 %vm112_vm1, %v22_v15 }
  0x5e   :  { %v61_v25 = vpop.permute.xlu2 %60 }
  0x5f   :  { %v70_v41 = vmul.f32 %v61_v25, %v40_v36 }
  0x66   :  { %v103_v38 = vpop.permute.xlu2 %102 }
  0x67   :  { %v108_v43 = vmul.f32 %v103_v38, %v84_v39 }
  0x74   :  { %v98_v19 = vpop.permute.xlu1 %97  ;;  %v93_v20 = vpop.permute.xlu0 %92 }
  0x75   :  { %v106_v21 = vmul.f32 %v93_v20, %v77_v18  ;;  %v107_v33 = vmul.f32 %v98_v19, %v79_v28 }
  0x77   :  { %298 = vmatmul.msk.f32.vlgmr.msra.gmra.mxu2 %vm112_vm1, %v106_v21 }
  0x7c   :  { %v56_v29 = vpop.permute.xlu0 %55  ;;  %v51_v30 = vpop.permute.xlu1 %50 }
  0x7d   :  { %v69_v31 = vmul.f32 %v56_v29, %v38_v26  ;;  %v68_v32 = vmul.f32 %v51_v30, %v47_v27 }
  0x7f   :  { %291 = vmatmul.msk.f32.vlgmr.msrb.gmra.mxu0 %vm112_vm1, %v68_v32  ;;  %292 = vmatmul.msk.f32.vlgmr.msra.gmra.mxu1 %vm112_vm1, %v69_v31 }
  0x80   :  { %299 = vmatmul.msk.f32.gmra.mxu2 %vm112_vm1, %v107_v33 }
  0x83   :  { %v142_v48 = vpop.f32.mrf.mxu0 }
  0x84   :  { %v88_v40 = vpop.permute.xlu0 %87  ;;  %v66_v45 = vpop.permute.xlu1 %65 }
  0x85   :  { %v105_v42 = vmul.f32 %v88_v40, %v75_v37  ;;  %v71_v47 = vmul.f32 %v66_v45, %v42_v46 }
  0x87   :  { %293 = vmatmul.msk.f32.gmra.mxu1 %vm112_vm1, %v70_v41  ;;  %297 = vmatmul.msk.f32.vlgmr.msra.gmra.mxu0 %vm112_vm1, %v105_v42 }
  0x88   :  { %300 = vmatmul.msk.f32.gmra.mxu2 %vm112_vm1, %v108_v43 }
  0x89   :  { %v145_v49 = vpop.f32.mrf.mxu3 }
  0x8f   :  { %294 = vmatmul.msk.f32.gmra.mxu1 %vm112_vm1, %v71_v47 }
  0x91   :  { %v148_v55 = vpop.f32.mrf.mxu3 }
  0x99   :  { %v151_v0 = vpop.f32.mrf.mxu3 }
  0xfa   :  { %v235_v50 = vpop.f32.mrf.mxu2 }
  0xfc   :  { %v186_v51 = vpop.f32.mrf.mxu0  ;;  %v189_v52 = vpop.f32.mrf.mxu1 }
  0xfd   :  { %v190_v53 = vadd.f32 %v189_v52, %v145_v49  ;;  %v187_v56 = vadd.f32 %v186_v51, %v142_v48 }
  0xff   :  { %v245_v54 = vadd.f32 %v235_v50, %v190_v53 }
 0x101   :  { %249 = vst [vmem:[%s424_s4 + $0x8] sm:$0xff] %v245_v54  ;;  %v262_v1 = vmul.f32 %v245_v54, %v245_v54 }
 0x103   :  { %v238_v57 = vpop.f32.mrf.mxu2 }
 0x104   :  { %v192_v58 = vpop.f32.mrf.mxu1  ;;  %v232_v59 = vpop.f32.mrf.mxu0 }
 0x105   :  { %v193_v60 = vadd.f32 %v192_v58, %v148_v55  ;;  %v244_v61 = vadd.f32 %v232_v59, %v187_v56 }
 0x107   :  { %v246_v62 = vadd.f32 %v238_v57, %v193_v60  ;;  %248 = vst [vmem:[%s424_s4] sm:$0xff] %v244_v61  ;;  %v261_v63 = vmul.f32 %v244_v61, %v244_v61  ;;  %v252_v2 = vadd.f32 %v245_v54, %v244_v61 }
 0x109   :  { %250 = vst [vmem:[%s424_s4 + $0x10] sm:$0xff] %v246_v62  ;;  %v263_v4 = vmul.f32 %v246_v62, %v246_v62  ;;  %v265_v5 = vadd.f32 %v262_v1, %v261_v63  ;;  %v253_v8 = vadd.f32 %v252_v2, %v246_v62 }
 0x10b   :  { %v241_v7 = vpop.f32.mrf.mxu2  ;;  %v266_v10 = vadd.f32 %v265_v5, %v263_v4 }
 0x10c   :  { %v195_v3 = vpop.f32.mrf.mxu1 }
 0x10d   :  { %v196_v6 = vadd.f32 %v195_v3, %v151_v0 }
 0x10f   :  { %v247_v9 = vadd.f32 %v241_v7, %v196_v6 }
 0x111   :  { %251 = vst [vmem:[%s424_s4 + $0x18] sm:$0xff] %v247_v9  ;;  %v254_v11 = vadd.f32 %v253_v8, %v247_v9  ;;  %v264_v12 = vmul.f32 %v247_v9, %v247_v9 }
 0x113   :  { %v255_v13 = vrot.slane %v254_v11, 4  ;;  %v267_v14 = vadd.f32 %v266_v10, %v264_v12 }
 0x115   :  { %v256_v15 = vadd.f32 %v255_v13, %v254_v11  ;;  %v268_v16 = vrot.slane %v267_v14, 4 }
 0x117   :  { %v257_v17 = vrot.slane %v256_v15, 2  ;;  %v269_v18 = vadd.f32 %v268_v16, %v267_v14 }
 0x119   :  { %v258_v19 = vadd.f32 %v257_v17, %v256_v15  ;;  %v270_v20 = vrot.slane %v269_v18, 2 }
 0x11b   :  { %v259_v21 = vrot.slane %v258_v19, 1  ;;  %v271_v22 = vadd.f32 %v270_v20, %v269_v18 }
 0x11d   :  { %v272_v23 = vrot.slane %v271_v22, 1  ;;  %v260_v24 = vadd.f32 %v259_v21, %v258_v19 }
 0x11f   :  { %v273_v25 = vadd.f32 %v272_v23, %v271_v22 }
 0x121   :  { %v274_v26 = vsel %vm35_vm3, %v260_v24, %v273_v25 }
 0x122   :  { %275 = vst [vmem:[%s425_s5] sm:$0x3] %v274_v26 }

</bundles_post_ra>
